<compile_context>
chip_gen: v7x
topology: tpu7x:2x2x1
jax: 0.10.0
libtpu: 0.0.40
codegen_flags: <defaults>
</compile_context>

<pallas_src>
import functools
import math

import jax
import jax.numpy as jnp
from jax.experimental import pallas as pl
from jax.experimental.pallas import tpu as pltpu


def _round_up(x, m):
    return (x + m - 1) // m * m


def _graph_node_feature_kernel(idx_ref, table_ref, o_ref, *, tk, count_dtype):
    """One (graph-block, vocab-chunk) grid step.

    idx_ref   : (rows, n_idx)  int32  -- combined, pre-offset table indices
    table_ref : (tk, H)        bf16   -- current vocab slab of the fused table
    o_ref     : (rows, H)      f32    -- resident across the vocab axis
    """
    k = pl.program_id(1)
    rows, n_idx = idx_ref.shape

    # Global column ids covered by this vocab slab.
    col = k * tk + jax.lax.broadcasted_iota(jnp.int32, (rows, tk), 1)
    idx = idx_ref[...]

    # Count matrix for this slab only ([rows, tk], never [rows, total]).
    # bf16 accumulation on v6e/v7x (exact for small integer counts), f32 on v5e.
    counts = (idx[:, 0:1] == col).astype(count_dtype)
    for j in range(1, n_idx):                       # static unroll, n_idx small
        counts = counts + (idx[:, j:j + 1] == col).astype(count_dtype)

    # Fused embedding matmul on the MXU: bf16 inputs, f32 accumulation.
    contrib = jnp.dot(counts.astype(jnp.bfloat16), table_ref[...],
                      preferred_element_type=jnp.float32)

    @pl.when(k == 0)
    def _():
        o_ref[...] = contrib

    @pl.when(k != 0)
    def _():
        o_ref[...] = o_ref[...] + contrib


def _choose_tiling(n_graph, rows_per_graph, target_block_rows, multi_core):
    """Pick (graphs per block, grid length) with 8-aligned block rows."""
    step = 8 // math.gcd(rows_per_graph, 8)      # bt granularity for 8-aligned rows
    max_bt = max(step, (target_block_rows // rows_per_graph) // step * step)
    bt = min(max_bt, _round_up(n_graph, step))
    grid_g = -(-n_graph // bt)
    if multi_core and grid_g == 1 and n_graph > step:
        # Split across the two TensorCores when there is enough work.
        bt = _round_up(-(-n_graph // 2), step)
        grid_g = -(-n_graph // bt)
    if multi_core and grid_g > 1 and grid_g % 2:
        grid_g += 1                                # keep both cores busy every step
    return bt, grid_g


def graph_node_feature(x, in_degree, out_degree,
                       atom_table, in_table, out_table, graph_token):
    n_graph, n_node, n_feat = x.shape
    hidden = atom_table.shape[1]
    A, DI, DO = atom_table.shape[0], in_table.shape[0], out_table.shape[0]
    rows_per_graph = n_node + 1
    n_idx = n_feat + 2

    # ---- per-generation tuning -------------------------------------------
    try:
        kind = jax.devices()[0].device_kind.lower()
    except Exception:
        kind = ""
    is_v5 = ("v5" in kind) or ("tpu5" in kind)
    is_v7 = ("v7" in kind) or ("tpu7" in kind)
    count_dtype = jnp.float32 if is_v5 else jnp.bfloat16   # v5e has no bf16 VALU
    vmem_limit = (48 if is_v7 else 96) * 1024 * 1024       # 64 MiB phys on v7x
    target_block_rows = 512 if is_v7 else 1024
    multi_core = is_v7

    # ---- combined table: [atom; in; out; graph_token; null row; zero pad] --
    tok_idx = A + DI + DO           # row of the graph token
    null_idx = tok_idx + 1          # guaranteed-zero row for padding slots
    total_raw = null_idx + 1
    tk = min(512, _round_up(total_raw, 128))     # vocab chunk (128-aligned)
    total_pad = _round_up(total_raw, tk)
    nk = total_pad // tk
    table = jnp.concatenate(
        [atom_table.astype(jnp.float32),
         in_table.astype(jnp.float32),
         out_table.astype(jnp.float32),
         graph_token.astype(jnp.float32).reshape(1, hidden),
         jnp.zeros((total_pad - total_raw + 1, hidden), jnp.float32)],
        axis=0).astype(jnp.bfloat16)

    # ---- unified, clipped & offset index matrix (built once in XLA) --------
    xi = jnp.clip(x.astype(jnp.int32), 0, A - 1)
    di = jnp.clip(in_degree.astype(jnp.int32), 0, DI - 1) + A
    do = jnp.clip(out_degree.astype(jnp.int32), 0, DO - 1) + (A + DI)
    node_idx = jnp.concatenate([xi, di[..., None], do[..., None]], axis=-1)
    tok_row = jnp.full((n_graph, 1, n_idx), null_idx, jnp.int32)
    tok_row = tok_row.at[:, :, 0].set(tok_idx)
    idx = jnp.concatenate([tok_row, node_idx], axis=1)       # (B, N+1, F+2)

    # ---- batch tiling / padding --------------------------------------------
    bt, grid_g = _choose_tiling(n_graph, rows_per_graph,
                                target_block_rows, multi_core)
    b_pad = bt * grid_g
    if b_pad > n_graph:
        pad = jnp.full((b_pad - n_graph, rows_per_graph, n_idx),
                       null_idx, jnp.int32)
        idx = jnp.concatenate([idx, pad], axis=0)
    idx = idx.reshape(b_pad * rows_per_graph, n_idx)
    block_rows = bt * rows_per_graph
    rows_total = b_pad * rows_per_graph

    kernel = functools.partial(_graph_node_feature_kernel,
                               tk=tk, count_dtype=count_dtype)

    grid_spec = pl.GridSpec(
        grid=(grid_g, nk),
        in_specs=[
            pl.BlockSpec((block_rows, n_idx), lambda g, k: (g, 0)),
            pl.BlockSpec((tk, hidden), lambda g, k: (k, 0)),
        ],
        out_specs=pl.BlockSpec((block_rows, hidden), lambda g, k: (g, 0)),
    )

    cost = pl.CostEstimate(
        flops=2 * rows_total * total_pad * hidden
              + (n_idx + 1) * rows_total * total_pad,
        transcendentals=0,
        bytes_accessed=(rows_total * n_idx * 4
                        + grid_g * total_pad * hidden * 2
                        + rows_total * hidden * 4),
    )

    out = pl.pallas_call(
        kernel,
        out_shape=jax.ShapeDtypeStruct((rows_total, hidden), jnp.float32),
        grid_spec=grid_spec,
        compiler_params=pltpu.CompilerParams(
            dimension_semantics=("parallel", "arbitrary"),
            vmem_limit_bytes=vmem_limit,
        ),
        cost_estimate=cost,
    )(idx, table)

    return out.reshape(b_pad, rows_per_graph, hidden)[:n_graph]


def _reference(x, in_degree, out_degree, atom_table, in_table, out_table,
               graph_token):
    node_feature = jnp.take(atom_table, x, axis=0).sum(axis=-2)
    node_feature = (node_feature
                    + jnp.take(in_table, in_degree, axis=0)
                    + jnp.take(out_table, out_degree, axis=0))
    n_graph = x.shape[0]
    gtok = jnp.broadcast_to(graph_token[None, :, :],
                            (n_graph, 1, graph_token.shape[1]))
    return jnp.concatenate([gtok, node_feature], axis=1)


if __name__ == "__main__":
    # Module hyper-parameters (small, consistent with GraphNodeFeature.__init__).
    num_heads = 4        # unused in forward
    num_atoms = 32
    num_in_degree = 16
    num_out_degree = 16
    hidden_dim = 128     # lane-dense output (multiple of 128)
    n_layers = 2

    # Data sizes
    n_graph, n_node, n_feat = 2, 8, 3

    key = jax.random.PRNGKey(0)
    k_atom, k_in, k_out, k_tok, k_x, k_id, k_od = jax.random.split(key, 7)

    # Deterministic parameter init mirroring init_params (Embedding ~ N(0, 0.02)).
    # Row 0 of the padding-idx encoders is zeroed (nn.Embedding padding semantics).
    atom_table = 0.02 * jax.random.normal(k_atom, (num_atoms + 1, hidden_dim),
                                          jnp.float32)
    atom_table = atom_table.at[0].set(0.0)
    in_table = 0.02 * jax.random.normal(k_in, (num_in_degree, hidden_dim),
                                        jnp.float32)
    in_table = in_table.at[0].set(0.0)
    out_table = 0.02 * jax.random.normal(k_out, (num_out_degree, hidden_dim),
                                         jnp.float32)
    out_table = out_table.at[0].set(0.0)
    graph_token = 0.02 * jax.random.normal(k_tok, (1, hidden_dim), jnp.float32)

    # Deterministic integer inputs.
    x = jax.random.randint(k_x, (n_graph, n_node, n_feat), 0, num_atoms + 1,
                           jnp.int32)
    in_degree = jax.random.randint(k_id, (n_graph, n_node), 0, num_in_degree,
                                   jnp.int32)
    out_degree = jax.random.randint(k_od, (n_graph, n_node), 0, num_out_degree,
                                    jnp.int32)

    out = graph_node_feature(x, in_degree, out_degree,
                             atom_table, in_table, out_table, graph_token)
    out = jax.block_until_ready(out)

    ref = _reference(x, in_degree, out_degree,
                     atom_table, in_table, out_table, graph_token)
    assert out.shape == (n_graph, n_node + 1, hidden_dim)
    # Tolerance covers the bf16 rounding of the table fed to the MXU
    # (~1e-3 relative); accumulation itself is f32.
    assert jnp.allclose(out, ref, atol=3e-3, rtol=1e-2), "mismatch vs reference"

    print("KERNEL_OK")
</pallas_src>

<mosaic_0001>
module attributes {stable_mosaic.version = 11 : i64} {
  func.func @_graph_node_feature_kernel(%arg0: i32, %arg1: i32, %arg2: memref<72x5xi32, #tpu.memory_space<vmem>>, %arg3: memref<128x128xbf16, #tpu.memory_space<vmem>>, %arg4: memref<72x128xf32, #tpu.memory_space<vmem>>) attributes {dimension_semantics = [#tpu.dimension_semantics<parallel>, #tpu.dimension_semantics<arbitrary>], iteration_bounds = array<i64: 1, 1>, scalar_prefetch = 0 : i64, scratch_operands = 0 : i64, tpu.core_type = #tpu.core_type<tc>, window_params = [{transform_indices = @transform_0, window_bounds = array<i64: 72, 5>}, {transform_indices = @transform_1, window_bounds = array<i64: 128, 128>}, {transform_indices = @transform_2, window_bounds = array<i64: 72, 128>}]} {
    %c128_i32 = arith.constant 128 : i32
    %0 = arith.muli %arg1, %c128_i32 : i32
    %1 = tpu.iota {dimensions = array<i32: 1>} : vector<72x128xi32>
    %2 = vector.broadcast %0 : i32 to vector<72x128xi32>
    %3 = arith.addi %2, %1 : vector<72x128xi32>
    %c0 = arith.constant 0 : index
    %c0_0 = arith.constant 0 : index
    %4 = vector.load %arg2[%c0, %c0_0] : memref<72x5xi32, #tpu.memory_space<vmem>>, vector<72x5xi32>
    %5 = vector.extract_strided_slice %4 {offsets = [0, 0], sizes = [72, 1], strides = [1, 1]} : vector<72x5xi32> to vector<72x1xi32>
    %6 = vector.broadcast %5 : vector<72x1xi32> to vector<72x128xi32>
    %7 = arith.cmpi eq, %6, %3 : vector<72x128xi32>
    %8 = arith.extui %7 : vector<72x128xi1> to vector<72x128xi32>
    %9 = arith.sitofp %8 : vector<72x128xi32> to vector<72x128xf32>
    %10 = arith.truncf %9 : vector<72x128xf32> to vector<72x128xbf16>
    %11 = vector.extract_strided_slice %4 {offsets = [0, 1], sizes = [72, 1], strides = [1, 1]} : vector<72x5xi32> to vector<72x1xi32>
    %12 = vector.broadcast %11 : vector<72x1xi32> to vector<72x128xi32>
    %13 = arith.cmpi eq, %12, %3 : vector<72x128xi32>
    %14 = arith.extui %13 : vector<72x128xi1> to vector<72x128xi32>
    %15 = arith.sitofp %14 : vector<72x128xi32> to vector<72x128xf32>
    %16 = arith.truncf %15 : vector<72x128xf32> to vector<72x128xbf16>
    %17 = arith.addf %10, %16 : vector<72x128xbf16>
    %18 = vector.extract_strided_slice %4 {offsets = [0, 2], sizes = [72, 1], strides = [1, 1]} : vector<72x5xi32> to vector<72x1xi32>
    %19 = vector.broadcast %18 : vector<72x1xi32> to vector<72x128xi32>
    %20 = arith.cmpi eq, %19, %3 : vector<72x128xi32>
    %21 = arith.extui %20 : vector<72x128xi1> to vector<72x128xi32>
    %22 = arith.sitofp %21 : vector<72x128xi32> to vector<72x128xf32>
    %23 = arith.truncf %22 : vector<72x128xf32> to vector<72x128xbf16>
    %24 = arith.addf %17, %23 : vector<72x128xbf16>
    %25 = vector.extract_strided_slice %4 {offsets = [0, 3], sizes = [72, 1], strides = [1, 1]} : vector<72x5xi32> to vector<72x1xi32>
    %26 = vector.broadcast %25 : vector<72x1xi32> to vector<72x128xi32>
    %27 = arith.cmpi eq, %26, %3 : vector<72x128xi32>
    %28 = arith.extui %27 : vector<72x128xi1> to vector<72x128xi32>
    %29 = arith.sitofp %28 : vector<72x128xi32> to vector<72x128xf32>
    %30 = arith.truncf %29 : vector<72x128xf32> to vector<72x128xbf16>
    %31 = arith.addf %24, %30 : vector<72x128xbf16>
    %32 = vector.extract_strided_slice %4 {offsets = [0, 4], sizes = [72, 1], strides = [1, 1]} : vector<72x5xi32> to vector<72x1xi32>
    %33 = vector.broadcast %32 : vector<72x1xi32> to vector<72x128xi32>
    %34 = arith.cmpi eq, %33, %3 : vector<72x128xi32>
    %35 = arith.extui %34 : vector<72x128xi1> to vector<72x128xi32>
    %36 = arith.sitofp %35 : vector<72x128xi32> to vector<72x128xf32>
    %37 = arith.truncf %36 : vector<72x128xf32> to vector<72x128xbf16>
    %38 = arith.addf %31, %37 : vector<72x128xbf16>
    %c0_1 = arith.constant 0 : index
    %c0_2 = arith.constant 0 : index
    %39 = vector.load %arg3[%c0_1, %c0_2] : memref<128x128xbf16, #tpu.memory_space<vmem>>, vector<128x128xbf16>
    %cst = arith.constant dense<0.000000e+00> : vector<72x128xf32>
    %40 = tpu.matmul %38, %39, %cst {dimension_numbers = #tpu.dot_dimension_numbers<[1], [0], [0], [1], [0, 0, 1, 1], [], []>} : vector<72x128xbf16>, vector<128x128xbf16>, vector<72x128xf32> -> vector<72x128xf32>
    %c0_i32 = arith.constant 0 : i32
    %41 = arith.cmpi eq, %arg1, %c0_i32 : i32
    %42 = arith.extui %41 : i1 to i32
    %c0_i32_3 = arith.constant 0 : i32
    %43 = arith.cmpi ne, %42, %c0_i32_3 : i32
    scf.if %43 {
      %c0_6 = arith.constant 0 : index
      %c0_7 = arith.constant 0 : index
      %47 = vector.load %arg4[%c0_6, %c0_7] : memref<72x128xf32, #tpu.memory_space<vmem>>, vector<72x128xf32>
      tpu.vector_store %arg4[%c0_6, %c0_7], %40 {strides = array<i32>} : memref<72x128xf32, #tpu.memory_space<vmem>>, vector<72x128xf32>,
    } else {
    }
    %c0_i32_4 = arith.constant 0 : i32
    %44 = arith.cmpi ne, %arg1, %c0_i32_4 : i32
    %45 = arith.extui %44 : i1 to i32
    %c0_i32_5 = arith.constant 0 : i32
    %46 = arith.cmpi ne, %45, %c0_i32_5 : i32
    scf.if %46 {
      %c0_6 = arith.constant 0 : index
      %c0_7 = arith.constant 0 : index
      %47 = vector.load %arg4[%c0_6, %c0_7] : memref<72x128xf32, #tpu.memory_space<vmem>>, vector<72x128xf32>
      %48 = arith.addf %47, %40 : vector<72x128xf32>
      %c0_8 = arith.constant 0 : index
      %c0_9 = arith.constant 0 : index
      %49 = vector.load %arg4[%c0_8, %c0_9] : memref<72x128xf32, #tpu.memory_space<vmem>>, vector<72x128xf32>
      tpu.vector_store %arg4[%c0_8, %c0_9], %48 {strides = array<i32>} : memref<72x128xf32, #tpu.memory_space<vmem>>, vector<72x128xf32>,
    } else {
    }
    return
  }
  func.func @transform_0(%arg0: i32, %arg1: i32) -> (i32, i32) {
    %c0_i32 = arith.constant 0 : i32
    %c0_i32_0 = arith.constant 0 : i32
    return %arg0, %c0_i32 : i32, i32
  }
  func.func @transform_1(%arg0: i32, %arg1: i32) -> (i32, i32) {
    %c0_i32 = arith.constant 0 : i32
    %c0_i32_0 = arith.constant 0 : i32
    return %arg1, %c0_i32 : i32, i32
  }
  func.func @transform_2(%arg0: i32, %arg1: i32) -> (i32, i32) {
    %c0_i32 = arith.constant 0 : i32
    %c0_i32_0 = arith.constant 0 : i32
    return %arg0, %c0_i32 : i32, i32
  }
}

</mosaic_0001>

<bundles_post_ra>
// kernel: tpu_custom_call.1
= control target key start
LH: loop header
LB: loop body
LE: loop exit
PB: predicated region body
PF: predicated region fallthrough
CT: control target
= control target key end

     0   :  { %7 = vsyncpa [#allocation3], 0  ;;  %s1094_s0 = inlined_call_operand.hbm [shape: s32[72,5], index: 0, kind: input, shape index: {}]   ;;  %s1095_s1 = inlined_call_operand.hbm [shape: bf16[128,128], index: 1, kind: input, shape index: {}]   ;;  %s1096_s2 = inlined_call_operand.hbm [shape: f32[72,128], index: 2, kind: output, shape index: {}]  }
   0x1   :  { %8 = vsyncpa [#allocation6], 0 }
   0x2   :  { %9 = vsyncpa [#allocation4], 0  ;;  %s803_s9 = smov [#allocation2]   ;;  %s731_s13 = scalar_lea.hbm %s1094_s0, 1152 }
   0x3   :  { %s15_s10 = sshll.u32 %s803_s9, 4  ;;  %p732_p0 = scmp.ne.s32.totalorder %s1094_s0, %s731_s13  ;;  %s16_s10 = int_to_ptr.vmem [resolvable:$true] %s15_s10 }
   0x4   :  { %p735_p1 = scmp.lt.u32.totalorder %s731_s13, %s1094_s0 }
   0x6   :  { %p737_p2 = pnand %p735_p1, %p732_p0 }
   0x8   :  { %740 = shalt.err (!%p737_p2)
}
   0x9   :  { %s741_s18 = scalar_lea.vmem %s16_s10, 1152  ;;  %p746_p4 = scmp.lt.s32.totalorder %s16_s10, %s16_s10 }
   0xa   :  { %p742_p3 = scmp.ne.s32.totalorder %s16_s10, %s741_s18  ;;  %p747_p5 = scmp.lt.s32.totalorder %s741_s18, %s741_s18 }
   0xc   :  { %p748_p6 = por %p747_p5, %p746_p4 }
   0xe   :  { %p749_p7 = pnand %p748_p6, %p742_p3 }
  0x10   :  { %752 = shalt.err (!%p749_p7)
}
  0x11   :  { %s804_s19 = smov 128   ;;  %s805_s20 = smov 8  }
  0x12   :  { %21 = dma.hbm_to_vmem [thread:$0]  %s1094_s0, 1152, %s16_s10, [#allocation3], %s804_s19, %s804_s19, %s805_s20  }
  0x13   :  { %s806_s23 = smov [#allocation5]   ;;  %s753_s27 = scalar_lea.hbm %s1095_s1, 1024 }
  0x14   :  { %s27_s24 = sshll.u32 %s806_s23, 4  ;;  %p754_p8 = scmp.ne.s32.totalorder %s1095_s1, %s753_s27  ;;  %s28_s24 = int_to_ptr.vmem [resolvable:$true] %s27_s24 }
  0x15   :  { %p757_p9 = scmp.lt.u32.totalorder %s753_s27, %s1095_s1 }
  0x17   :  { %p759_p10 = pnand %p757_p9, %p754_p8 }
  0x19   :  { %762 = shalt.err (!%p759_p10)
}
  0x1a   :  { %s763_s4 = scalar_lea.vmem %s28_s24, 1024  ;;  %p768_p12 = scmp.lt.s32.totalorder %s28_s24, %s28_s24 }
  0x1b   :  { %p764_p11 = scmp.ne.s32.totalorder %s28_s24, %s763_s4  ;;  %p769_p13 = scmp.lt.s32.totalorder %s763_s4, %s763_s4 }
  0x1d   :  { %p770_p0 = por %p769_p13, %p768_p12 }
  0x1f   :  { %p771_p1 = pnand %p770_p0, %p764_p11 }
  0x21   :  { %774 = shalt.err (!%p771_p1)
}
  0x22   :  { %s807_s0 = smov 64   ;;  %s808_s5 = smov 4  }
  0x23   :  { %33 = dma.hbm_to_vmem [thread:$0]  %s1095_s1, 1024, %s28_s24, [#allocation6], %s807_s0, %s807_s0, %s808_s5  }
  0x24   :  { %797 = dma.done.wait [#allocation3], 1152  }
  0x25   :  { %798 = vsyncadd [#allocation3], 4294966144 }
  0x26   :  { %799 = dma.done.wait [#allocation6], 1024  }
  0x27   :  { %800 = vsyncadd [#allocation6], 4294966272  ;;  %v809_v0 = vmov 3   ;;  %v810_v1 = vmov 1   ;;  %v811_v2 = vmov 0.0   ;;  %v47_v3 = vld [vmem:[#allocation2 + $0x8] sm:$0xff]  ;;  %v42_v37 = vlaneseq }
  0x28   :  { %703 = vset.pattern.permute.xlu0 %v809_v0  ;;  %700 = vset.pattern.permute.xlu1 %v810_v1  ;;  %v863_v4 = vld [vmem:[#allocation2] sm:$0xff]  ;;  %v866_v5 = vld [vmem:[#allocation2 + $0x18] sm:$0xff]  ;;  %v869_v6 = vld [vmem:[#allocation2 + $0x30] sm:$0xff]  ;;  %v812_v7 = vmov 2   ;;  %v813_v9 = vmov 4   ;;  %v814_v12 = vmov 0  }
  0x29   :  { %634 = vmatprep.subr.bf16.mxu0 %v811_v2  ;;  %670 = vmatprep.subr.bf16.mxu1 %v811_v2  ;;  %v874_v8 = vld [vmem:[#allocation2 + $0x10] sm:$0xff]  ;;  %v880_v10 = vld [vmem:[#allocation2 + $0x38] sm:$0xff]  ;;  %v723_v11 = vld [vmem:[#allocation5] sm:$0xff]   ;;  %vm815_vm0 = vmmov 0   ;;  %v961_v40 = vand.u32 127, %v42_v37  ;;  %s816_s1 = smov [#allocation7]  }
  0x2a   :  { %246 = vperm.xlu0 %703, %v47_v3   ;;  %115 = vperm.xlu1 %700, %v863_v4   ;;  %v724_v13 = vld [vmem:[#allocation5 + $0x8] sm:$0xff]   ;;  %v725_v14 = vld [vmem:[#allocation5 + $0x10] sm:$0xff]   ;;  %v895_v15 = vld [vmem:[#allocation2 + $0x28] sm:$0xff]  ;;  %s555_s8 = sshll.u32 %s816_s1, 4  ;;  %s556_s8 = int_to_ptr.vmem [resolvable:$true] %s555_s8 }
  0x2b   :  { %635 = vmatpush3.bf16.msra.mxu0 %v723_v11  ;;  %678 = vmatpush3.bf16.msra.mxu1 %v723_v11  ;;  %v726_v16 = vld [vmem:[#allocation5 + $0x18] sm:$0xff]   ;;  %v727_v18 = vld [vmem:[#allocation5 + $0x20] sm:$0xff]   ;;  %v728_v19 = vld [vmem:[#allocation5 + $0x28] sm:$0xff]   ;;  %s775_s9 = scalar_lea.vmem %s556_s8, 1152  ;;  %p780_p3 = scmp.lt.s32.totalorder %s556_s8, %s556_s8 }
  0x2c   :  { %636 = vmatprep.subr.bf16.mxu0 %v811_v2  ;;  %671 = vmatprep.subr.bf16.mxu1 %v811_v2  ;;  %v901_v17 = vld [vmem:[#allocation2 + $0x40] sm:$0xff]  ;;  %v729_v20 = vld [vmem:[#allocation5 + $0x30] sm:$0xff]   ;;  %p776_p2 = scmp.ne.s32.totalorder %s556_s8, %s775_s9  ;;  %p781_p4 = scmp.lt.s32.totalorder %s775_s9, %s775_s9 }
  0x2d   :  { %v730_v21 = vld [vmem:[#allocation5 + $0x38] sm:$0xff]   ;;  %650 = vmatprep.mubr.msk.bf16.mxu0 %vm815_vm0, %v811_v2  ;;  %662 = vmatprep.mubr.msk.bf16.mxu1 %vm815_vm0, %v811_v2 }
  0x2e   :  { %707 = vset.pattern.permute.xlu0 %v810_v1  ;;  %118 = vperm.xlu1 %700, %v47_v3   ;;  %v50_v22 = vld [vmem:[#allocation2 + $0x20] sm:$0xff]  ;;  %p782_p5 = por %p781_p4, %p780_p3 }
  0x2f   :  { %124 = vperm.xlu0 %707, %v866_v5   ;;  %637 = vmatpush3.bf16.msra.mxu0 %v724_v13 }
  0x30   :  { %638 = vmatprep.subr.bf16.mxu0 %v811_v2  ;;  %679 = vmatpush3.bf16.msra.mxu1 %v724_v13  ;;  %p783_p6 = pnand %p782_p5, %p776_p2 }
  0x31   :  { %672 = vmatprep.subr.bf16.mxu1 %v811_v2 }
  0x32   :  { %701 = vset.pattern.permute.xlu1 %v812_v7 }
  0x33   :  { %133 = vperm.xlu0 %707, %v869_v6   ;;  %182 = vperm.xlu1 %701, %v47_v3  }
  0x34   :  { %639 = vmatpush3.bf16.msra.mxu0 %v725_v14  ;;  %680 = vmatpush3.bf16.msra.mxu1 %v725_v14 }
  0x35   :  { %640 = vmatprep.subr.bf16.mxu0 %v811_v2  ;;  %673 = vmatprep.subr.bf16.mxu1 %v811_v2 }
  0x37   :  { %712 = vset.pattern.permute.xlu0 %v813_v9  ;;  %702 = vset.pattern.permute.xlu1 %v809_v0 }
  0x38   :  { %313 = vperm.xlu0 %712, %v874_v8   ;;  %243 = vperm.xlu1 %702, %v863_v4  }
  0x39   :  { %641 = vmatpush3.bf16.msra.mxu0 %v726_v16  ;;  %681 = vmatpush3.bf16.msra.mxu1 %v726_v16 }
  0x3a   :  { %642 = vmatprep.subr.bf16.mxu0 %v811_v2  ;;  %674 = vmatprep.subr.bf16.mxu1 %v811_v2 }
  0x3c   :  { %328 = vperm.xlu0 %712, %v880_v10   ;;  %704 = vset.pattern.permute.xlu1 %v813_v9 }
  0x3d   :  { %307 = vperm.xlu1 %704, %v863_v4   ;;  %643 = vmatpush3.bf16.msra.mxu0 %v727_v18 }
  0x3e   :  { %644 = vmatprep.subr.bf16.mxu0 %v811_v2  ;;  %682 = vmatpush3.bf16.msra.mxu1 %v727_v18 }
  0x3f   :  { %675 = vmatprep.subr.bf16.mxu1 %v811_v2 }
  0x40   :  { %714 = vset.pattern.permute.xlu0 %v814_v12 }
  0x41   :  { %56 = vperm.xlu0 %714, %v863_v4   ;;  %310 = vperm.xlu1 %704, %v47_v3  }
  0x42   :  { %645 = vmatpush3.bf16.msra.mxu0 %v728_v19  ;;  %683 = vmatpush3.bf16.msra.mxu1 %v728_v19 }
  0x43   :  { %646 = vmatprep.subr.bf16.mxu0 %v811_v2  ;;  %676 = vmatprep.subr.bf16.mxu1 %v811_v2 }
  0x45   :  { %59 = vperm.xlu0 %714, %v47_v3   ;;  %705 = vset.pattern.permute.xlu1 %v814_v12 }
  0x46   :  { %65 = vperm.xlu1 %705, %v866_v5   ;;  %647 = vmatpush3.bf16.msra.mxu0 %v729_v20 }
  0x47   :  { %648 = vmatprep.subr.bf16.mxu0 %v811_v2  ;;  %684 = vmatpush3.bf16.msra.mxu1 %v729_v20 }
  0x48   :  { %677 = vmatprep.subr.bf16.mxu1 %v811_v2 }
  0x49   :  { %62 = vperm.xlu0 %714, %v874_v8  }
  0x4a   :  { %706 = vset.pattern.permute.xlu1 %v810_v1  ;;  %649 = vmatpush3.bf16.msra.mxu0 %v730_v21 }
  0x4b   :  { %121 = vperm.xlu1 %706, %v874_v8   ;;  %685 = vmatpush3.bf16.msra.mxu1 %v730_v21 }
  0x4d   :  { %71 = vperm.xlu0 %714, %v895_v15  }
  0x4f   :  { %708 = vset.pattern.permute.xlu1 %v814_v12 }
  0x50   :  { %74 = vperm.xlu1 %708, %v869_v6  }
  0x51   :  { %80 = vperm.xlu0 %714, %v901_v17  }
  0x54   :  { %77 = vperm.xlu1 %708, %v880_v10  }
  0x55   :  { %717 = vset.pattern.permute.xlu0 %v812_v7 }
  0x56   :  { %179 = vperm.xlu0 %717, %v863_v4  }
  0x58   :  { %709 = vset.pattern.permute.xlu1 %v810_v1 }
  0x59   :  { %136 = vperm.xlu1 %709, %v880_v10  }
  0x5a   :  { %185 = vperm.xlu0 %717, %v874_v8  }
  0x5d   :  { %710 = vset.pattern.permute.xlu1 %v812_v7 }
  0x5e   :  { %200 = vperm.xlu0 %717, %v880_v10   ;;  %188 = vperm.xlu1 %710, %v866_v5  }
  0x62   :  { %191 = vperm.xlu0 %717, %v50_v22   ;;  %197 = vperm.xlu1 %710, %v869_v6  }
  0x66   :  { %718 = vset.pattern.permute.xlu0 %v809_v0  ;;  %711 = vset.pattern.permute.xlu1 %v809_v0 }
  0x67   :  { %252 = vperm.xlu0 %718, %v866_v5   ;;  %249 = vperm.xlu1 %711, %v874_v8  }
  0x6b   :  { %261 = vperm.xlu1 %711, %v869_v6   ;;  %255 = vperm.xlu0 %718, %v50_v22  }
  0x6f   :  { %264 = vperm.xlu1 %711, %v880_v10   ;;  %721 = vset.pattern.permute.xlu0 %v813_v9 }
  0x70   :  { %319 = vperm.xlu0 %721, %v50_v22  }
  0x73   :  { %713 = vset.pattern.permute.xlu1 %v813_v9 }
  0x74   :  { %316 = vperm.xlu1 %713, %v866_v5  }
  0x78   :  { %325 = vperm.xlu1 %713, %v869_v6  }
  0x7c   :  { %715 = vset.pattern.permute.xlu1 %v814_v12 }
  0x7d   :  { %68 = vperm.xlu1 %715, %v50_v22  }
  0x81   :  { %716 = vset.pattern.permute.xlu1 %v810_v1 }
  0x82   :  { %127 = vperm.xlu1 %716, %v50_v22  }
  0x86   :  { %130 = vperm.xlu1 %716, %v895_v15  }
  0x8a   :  { %139 = vperm.xlu1 %716, %v901_v17  }
  0x8e   :  { %719 = vset.pattern.permute.xlu1 %v812_v7 }
  0x8f   :  { %194 = vperm.xlu1 %719, %v895_v15  }
  0x93   :  { %203 = vperm.xlu1 %719, %v901_v17  }
  0x97   :  { %720 = vset.pattern.permute.xlu1 %v809_v0 }
  0x98   :  { %258 = vperm.xlu1 %720, %v895_v15  }
  0x9c   :  { %267 = vperm.xlu1 %720, %v901_v17  }
  0xa0   :  { %722 = vset.pattern.permute.xlu1 %v813_v9 }
  0xa1   :  { %322 = vperm.xlu1 %722, %v895_v15  }
  0xa5   :  { %331 = vperm.xlu1 %722, %v901_v17  }
  0xa9   :  { %v116_v23 = vpop.permute.xlu1 %115  ;;  %v247_v24 = vpop.permute.xlu0 %246 }
  0xaa   :  { %vm141_vm4 = vcmp.eq.s32.totalorder %v116_v23, %v961_v40  ;;  %vm270_vm5 = vcmp.eq.s32.totalorder %v247_v24, %v961_v40 }
  0xab   :  { %v577_v49 = vsel %vm141_vm4, 1.0, %v811_v2  ;;  %v596_v52 = vsel %vm270_vm5, 1.0, %v811_v2 }
  0xad   :  { %v119_v25 = vpop.permute.xlu1 %118 }
  0xae   :  { %v951_v26 = vpop.permute.xlu0 %124  ;;  %vm142_vm3 = vcmp.eq.s32.totalorder %v119_v25, %v961_v40 }
  0xaf   :  { %v578_v46 = vsel %vm142_vm3, 1.0, %v811_v2  ;;  %vm144_vm11 = vcmp.eq.s32.totalorder %v951_v26, %v961_v40 }
  0xb0   :  { %v168_v51 = vpack.c.bf16 %v578_v46, %v577_v49  ;;  %v580_v11 = vsel %vm144_vm11, 1.0, %v811_v2 }
  0xb2   :  { %v183_v27 = vpop.permute.xlu1 %182  ;;  %v953_v28 = vpop.permute.xlu0 %133 }
  0xb3   :  { %vm206_vm6 = vcmp.eq.s32.totalorder %v183_v27, %v961_v40  ;;  %vm147_vm13 = vcmp.eq.s32.totalorder %v953_v28, %v961_v40 }
  0xb4   :  { %v587_v53 = vsel %vm206_vm6, 1.0, %v811_v2  ;;  %v583_v13 = vsel %vm147_vm13, 1.0, %v811_v2 }
  0xb7   :  { %v244_v29 = vpop.permute.xlu1 %243  ;;  %v955_v30 = vpop.permute.xlu0 %313 }
  0xb8   :  { %vm269_vm7 = vcmp.eq.s32.totalorder %v244_v29, %v961_v40  ;;  %vm335_vm11 = vcmp.eq.s32.totalorder %v955_v30, %v961_v40 }
  0xb9   :  { %v595_v54 = vsel %vm269_vm7, 1.0, %v811_v2  ;;  %v606_v30 = vsel %vm335_vm11, 1.0, %v811_v2 }
  0xba   :  { %v296_v61 = vpack.c.bf16 %v596_v52, %v595_v54 }
  0xbb   :  { %v957_v31 = vpop.permute.xlu0 %328 }
  0xbc   :  { %v308_v32 = vpop.permute.xlu1 %307 }
  0xbd   :  { %vm333_vm10 = vcmp.eq.s32.totalorder %v308_v32, %v961_v40 }
  0xbe   :  { %v604_v63 = vsel %vm333_vm10, 1.0, %v811_v2 }
  0xc0   :  { %v57_v33 = vpop.permute.xlu0 %56  ;;  %v311_v34 = vpop.permute.xlu1 %310 }
  0xc1   :  { %vm82_vm1 = vcmp.eq.s32.totalorder %v57_v33, %v961_v40  ;;  %vm334_vm8 = vcmp.eq.s32.totalorder %v311_v34, %v961_v40 }
  0xc2   :  { %v568_v44 = vsel %vm82_vm1, 1.0, %v811_v2  ;;  %v605_v59 = vsel %vm334_vm8, 1.0, %v811_v2 }
  0xc3   :  { %v360_v0 = vpack.c.bf16 %v605_v59, %v604_v63 }
  0xc4   :  { %v60_v35 = vpop.permute.xlu0 %59 }
  0xc5   :  { %v959_v36 = vpop.permute.xlu1 %65  ;;  %vm83_vm2 = vcmp.eq.s32.totalorder %v60_v35, %v961_v40 }
  0xc6   :  { %v569_v45 = vsel %vm83_vm2, 1.0, %v811_v2  ;;  %vm85_vm2 = vcmp.eq.s32.totalorder %v959_v36, %v961_v40 }
  0xc7   :  { %v109_v48 = vpack.c.bf16 %v569_v45, %v568_v44  ;;  %v571_v19 = vsel %vm85_vm2, 1.0, %v811_v2 }
  0xc8   :  { %v63_v38 = vpop.permute.xlu0 %62 }
  0xc9   :  { %v173_v56 = vadd.bf16 %v168_v51, %v109_v48  ;;  %vm84_vm14 = vcmp.eq.s32.totalorder %v63_v38, %v961_v40 }
  0xca   :  { %v122_v39 = vpop.permute.xlu1 %121  ;;  %v570_v14 = vsel %vm84_vm14, 1.0, %v811_v2  ;;  %vm340_vm14 = vcmp.eq.s32.totalorder %v957_v31, %v961_v40 }
  0xcb   :  { %vm143_vm12 = vcmp.eq.s32.totalorder %v122_v39, %v961_v40  ;;  %v110_v23 = vpack.c.bf16 %v571_v19, %v570_v14  ;;  %v611_v51 = vsel %vm340_vm14, 1.0, %v811_v2 }
  0xcc   :  { %v963_v41 = vpop.permute.xlu0 %71  ;;  %v579_v12 = vsel %vm143_vm12, 1.0, %v811_v2 }
  0xcd   :  { %v169_v17 = vpack.c.bf16 %v580_v11, %v579_v12 }
  0xcf   :  { %v967_v42 = vpop.permute.xlu1 %74  ;;  %v174_v28 = vadd.bf16 %v169_v17, %v110_v23 }
  0xd0   :  { %v970_v43 = vpop.permute.xlu0 %80 }
  0xd3   :  { %v976_v47 = vpop.permute.xlu1 %77 }
  0xd4   :  { %vm89_vm6 = vcmp.eq.s32.totalorder %v976_v47, %v961_v40 }
  0xd5   :  { %v180_v50 = vpop.permute.xlu0 %179  ;;  %v575_v25 = vsel %vm89_vm6, 1.0, %v811_v2 }
  0xd6   :  { %vm205_vm9 = vcmp.eq.s32.totalorder %v180_v50, %v961_v40 }
  0xd7   :  { %v586_v55 = vsel %vm205_vm9, 1.0, %v811_v2  ;;  %vm88_vm9 = vcmp.eq.s32.totalorder %v967_v42, %v961_v40 }
  0xd8   :  { %v232_v57 = vpack.c.bf16 %v587_v53, %v586_v55  ;;  %v137_v58 = vpop.permute.xlu1 %136  ;;  %v574_v33 = vsel %vm88_vm9, 1.0, %v811_v2  ;;  %vm90_vm9 = vcmp.eq.s32.totalorder %v970_v43, %v961_v40 }
  0xd9   :  { %v186_v60 = vpop.permute.xlu0 %185  ;;  %vm148_vm3 = vcmp.eq.s32.totalorder %v137_v58, %v961_v40  ;;  %v112_v36 = vpack.c.bf16 %v575_v25, %v574_v33  ;;  %v576_v43 = vsel %vm90_vm9, 1.0, %v811_v2 }
  0xda   :  { %v237_v62 = vadd.bf16 %v232_v57, %v173_v56  ;;  %vm207_vm15 = vcmp.eq.s32.totalorder %v186_v60, %v961_v40  ;;  %v584_v20 = vsel %vm148_vm3, 1.0, %v811_v2 }
  0xdb   :  { %v588_v15 = vsel %vm207_vm15, 1.0, %v811_v2  ;;  %v171_v29 = vpack.c.bf16 %v584_v20, %v583_v13  ;;  %v113_v20 = vpack.c.bf16 %v576_v43, %v576_v43 }
  0xdc   :  { %v301_v1 = vadd.bf16 %v296_v61, %v237_v62 }
  0xdd   :  { %v189_v3 = vpop.permute.xlu1 %188  ;;  %v201_v4 = vpop.permute.xlu0 %200  ;;  %v176_v44 = vadd.bf16 %v171_v29, %v112_v36 }
  0xde   :  { %v365_v5 = vadd.bf16 %v360_v0, %v301_v1  ;;  %vm208_vm1 = vcmp.eq.s32.totalorder %v189_v3, %v961_v40  ;;  %vm212_vm7 = vcmp.eq.s32.totalorder %v201_v4, %v961_v40 }
  0xdf   :  { %v589_v16 = vsel %vm208_vm1, 1.0, %v811_v2  ;;  %v593_v26 = vsel %vm212_vm7, 1.0, %v811_v2 }
  0xe0   :  { %651 = vmatmul.mubr.bf16.vlgmr.msra.gmra.mrb[0].mxu0 %v365_v5  ;;  %v233_v24 = vpack.c.bf16 %v589_v16, %v588_v15 }
  0xe1   :  { %v198_v6 = vpop.permute.xlu1 %197  ;;  %654 = vmatprep.mubr.msk.bf16.mxu0 %vm815_vm0, %v811_v2  ;;  %v993_v7 = vpop.permute.xlu0 %191 }
  0xe2   :  { %vm211_vm8 = vcmp.eq.s32.totalorder %v198_v6, %v961_v40  ;;  %v238_v37 = vadd.bf16 %v233_v24, %v174_v28 }
  0xe3   :  { %v592_v27 = vsel %vm211_vm8, 1.0, %v811_v2 }
  0xe4   :  { %v235_v38 = vpack.c.bf16 %v593_v26, %v592_v27 }
  0xe6   :  { %v250_v8 = vpop.permute.xlu1 %249  ;;  %v253_v9 = vpop.permute.xlu0 %252  ;;  %v240_v49 = vadd.bf16 %v235_v38, %v176_v44 }
  0xe7   :  { %vm272_vm4 = vcmp.eq.s32.totalorder %v253_v9, %v961_v40  ;;  %vm271_vm5 = vcmp.eq.s32.totalorder %v250_v8, %v961_v40 }
  0xe8   :  { %v598_v21 = vsel %vm272_vm4, 1.0, %v811_v2  ;;  %v597_v22 = vsel %vm271_vm5, 1.0, %v811_v2  ;;  %vm87_vm5 = vcmp.eq.s32.totalorder %v963_v41, %v961_v40 }
  0xe9   :  { %v297_v32 = vpack.c.bf16 %v598_v21, %v597_v22  ;;  %v573_v41 = vsel %vm87_vm5, 1.0, %v811_v2 }
  0xea   :  { %v262_v10 = vpop.permute.xlu1 %261  ;;  %v256_v61 = vpop.permute.xlu0 %255 }
  0xeb   :  { %vm275_vm12 = vcmp.eq.s32.totalorder %v262_v10, %v961_v40  ;;  %v302_v45 = vadd.bf16 %v297_v32, %v238_v37  ;;  %vm273_vm7 = vcmp.eq.s32.totalorder %v256_v61, %v961_v40 }
  0xec   :  { %v601_v39 = vsel %vm275_vm12, 1.0, %v811_v2  ;;  %v599_v9 = vsel %vm273_vm7, 1.0, %v811_v2 }
  0xee   :  { %v265_v18 = vpop.permute.xlu1 %264 }
  0xef   :  { %vm276_vm10 = vcmp.eq.s32.totalorder %v265_v18, %v961_v40  ;;  %v320_v4 = vpop.permute.xlu0 %319 }
  0xf0   :  { %v602_v34 = vsel %vm276_vm10, 1.0, %v811_v2  ;;  %vm337_vm12 = vcmp.eq.s32.totalorder %v320_v4, %v961_v40 }
  0xf1   :  { %v299_v46 = vpack.c.bf16 %v602_v34, %v601_v39  ;;  %v608_v18 = vsel %vm337_vm12, 1.0, %v811_v2 }
  0xf3   :  { %v317_v35 = vpop.permute.xlu1 %316  ;;  %v304_v53 = vadd.bf16 %v299_v46, %v240_v49 }
  0xf4   :  { %vm336_vm13 = vcmp.eq.s32.totalorder %v317_v35, %v961_v40 }
  0xf5   :  { %v607_v42 = vsel %vm336_vm13, 1.0, %v811_v2 }
  0xf6   :  { %v361_v47 = vpack.c.bf16 %v607_v42, %v606_v30 }
  0xf7   :  { %v326_v48 = vpop.permute.xlu1 %325 }
  0xf8   :  { %vm339_vm15 = vcmp.eq.s32.totalorder %v326_v48, %v961_v40  ;;  %v366_v50 = vadd.bf16 %v361_v47, %v302_v45 }
  0xf9   :  { %v610_v52 = vsel %vm339_vm15, 1.0, %v811_v2 }
  0xfa   :  { %v363_v54 = vpack.c.bf16 %v611_v51, %v610_v52  ;;  %655 = vmatmul.mubr.bf16.gmra.mrb[4].mxu0 %v366_v50 }
  0xfb   :  { %658 = vmatprep.mubr.msk.bf16.mxu0 %vm815_vm0, %v811_v2 }
  0xfc   :  { %v69_v31 = vpop.permute.xlu1 %68  ;;  %v368_v55 = vadd.bf16 %v363_v54, %v304_v53 }
  0xfd   :  { %vm86_vm2 = vcmp.eq.s32.totalorder %v69_v31, %v961_v40 }
  0xfe   :  { %663 = vmatmul.mubr.bf16.vlgmr.msra.gmra.mrb[0].mxu1 %v368_v55  ;;  %v572_v0 = vsel %vm86_vm2, 1.0, %v811_v2 }
  0xff   :  { %666 = vmatprep.mubr.msk.bf16.mxu1 %vm815_vm0, %v811_v2  ;;  %vm209_vm0 = vcmp.eq.s32.totalorder %v993_v7, %v961_v40  ;;  %v111_v11 = vpack.c.bf16 %v573_v41, %v572_v0 }
 0x100   :  { %v590_v7 = vsel %vm209_vm0, 1.0, %v811_v2 }
 0x101   :  { %v128_v56 = vpop.permute.xlu1 %127 }
 0x102   :  { %vm145_vm3 = vcmp.eq.s32.totalorder %v128_v56, %v961_v40 }
 0x103   :  { %v581_v1 = vsel %vm145_vm3, 1.0, %v811_v2 }
 0x105   :  { %v131_v57 = vpop.permute.xlu1 %130 }
 0x106   :  { %vm146_vm1 = vcmp.eq.s32.totalorder %v131_v57, %v961_v40 }
 0x107   :  { %v582_v63 = vsel %vm146_vm1, 1.0, %v811_v2 }
 0x108   :  { %v170_v5 = vpack.c.bf16 %v582_v63, %v581_v1 }
 0x109   :  { %v140_v58 = vpop.permute.xlu1 %139 }
 0x10a   :  { %vm149_vm6 = vcmp.eq.s32.totalorder %v140_v58, %v961_v40  ;;  %v175_v14 = vadd.bf16 %v170_v5, %v111_v11 }
 0x10b   :  { %v585_v8 = vsel %vm149_vm6, 1.0, %v811_v2 }
 0x10c   :  { %v172_v15 = vpack.c.bf16 %v585_v8, %v585_v8 }
 0x10e   :  { %v195_v59 = vpop.permute.xlu1 %194  ;;  %v177_v24 = vadd.bf16 %v172_v15, %v113_v20 }
 0x10f   :  { %vm210_vm4 = vcmp.eq.s32.totalorder %v195_v59, %v961_v40 }
 0x110   :  { %v591_v3 = vsel %vm210_vm4, 1.0, %v811_v2 }
 0x111   :  { %v234_v12 = vpack.c.bf16 %v591_v3, %v590_v7 }
 0x112   :  { %v204_v60 = vpop.permute.xlu1 %203 }
 0x113   :  { %vm213_vm10 = vcmp.eq.s32.totalorder %v204_v60, %v961_v40  ;;  %v239_v21 = vadd.bf16 %v234_v12, %v175_v14 }
 0x114   :  { %v594_v13 = vsel %vm213_vm10, 1.0, %v811_v2 }
 0x115   :  { %v236_v22 = vpack.c.bf16 %v594_v13, %v594_v13 }
 0x117   :  { %v259_v62 = vpop.permute.xlu1 %258  ;;  %v241_v29 = vadd.bf16 %v236_v22, %v177_v24 }
 0x118   :  { %vm274_vm8 = vcmp.eq.s32.totalorder %v259_v62, %v961_v40 }
 0x119   :  { %v600_v10 = vsel %vm274_vm8, 1.0, %v811_v2 }
 0x11a   :  { %v298_v16 = vpack.c.bf16 %v600_v10, %v599_v9 }
 0x11b   :  { %v268_v6 = vpop.permute.xlu1 %267 }
 0x11c   :  { %vm277_vm11 = vcmp.eq.s32.totalorder %v268_v6, %v961_v40  ;;  %v303_v25 = vadd.bf16 %v298_v16, %v239_v21 }
 0x11d   :  { %v603_v17 = vsel %vm277_vm11, 1.0, %v811_v2 }
 0x11e   :  { %v300_v26 = vpack.c.bf16 %v603_v17, %v603_v17 }
 0x120   :  { %v323_v19 = vpop.permute.xlu1 %322  ;;  %v305_v34 = vadd.bf16 %v300_v26, %v241_v29 }
 0x121   :  { %vm338_vm13 = vcmp.eq.s32.totalorder %v323_v19, %v961_v40 }
 0x122   :  { %v609_v23 = vsel %vm338_vm13, 1.0, %v811_v2 }
 0x123   :  { %v362_v27 = vpack.c.bf16 %v609_v23, %v608_v18 }
 0x124   :  { %v332_v28 = vpop.permute.xlu1 %331 }
 0x125   :  { %vm341_vm14 = vcmp.eq.s32.totalorder %v332_v28, %v961_v40  ;;  %v367_v32 = vadd.bf16 %v362_v27, %v303_v25 }
 0x126   :  { %v612_v33 = vsel %vm341_vm14, 1.0, %v811_v2 }
 0x127   :  { %v364_v35 = vpack.c.bf16 %v612_v33, %v612_v33  ;;  %659 = vmatmul.mubr.bf16.gmra.mrb[8].mxu0 %v367_v32 }
 0x129   :  { %v369_v36 = vadd.bf16 %v364_v35, %v305_v34 }
 0x12b   :  { %667 = vmatmul.mubr.bf16.gmra.mrb[4].mxu1 %v369_v36 }
 0x1b3   :  { %v468_v37 = vpop.f32.mrb[0].mxu0 }
 0x1b4   :  { %510 = vst [vmem:[#allocation7] sm:$0xff] %v468_v37  ;;  %v652_v38 = vpop.f32.mrb[1].mxu0 }
 0x1b5   :  { %v471_v30 = vpop.f32.mrb[2].mxu0 }
 0x1b6   :  { %511 = vst [vmem:[#allocation7 + $0x8] sm:$0xff] %v471_v30  ;;  %v653_v39 = vpop.f32.mrb[3].mxu0 }
 0x1cd   :  { %v476_v42 = vpop.f32.mrb[4].mxu0 }
 0x1ce   :  { %512 = vst [vmem:[#allocation7 + $0x10] sm:$0xff] %v476_v42  ;;  %v656_v44 = vpop.f32.mrb[5].mxu0 }
 0x1cf   :  { %v479_v45 = vpop.f32.mrb[6].mxu0 }
 0x1d0   :  { %513 = vst [vmem:[#allocation7 + $0x18] sm:$0xff] %v479_v45  ;;  %v657_v40 = vpop.f32.mrb[7].mxu0 }
 0x1d1   :  { %v492_v46 = vpop.f32.mrb[0].mxu1 }
 0x1d2   :  { %516 = vst [vmem:[#allocation7 + $0x30] sm:$0xff] %v492_v46  ;;  %v664_v2 = vpop.f32.mrb[1].mxu1 }
 0x1d3   :  { %v495_v47 = vpop.f32.mrb[2].mxu1 }
 0x1d4   :  { %517 = vst [vmem:[#allocation7 + $0x38] sm:$0xff] %v495_v47  ;;  %v665_v48 = vpop.f32.mrb[3].mxu1 }
 0x1fa   :  { %v484_v49 = vpop.f32.mrb[8].mxu0 }
 0x1fb   :  { %514 = vst [vmem:[#allocation7 + $0x20] sm:$0xff] %v484_v49  ;;  %v660_v50 = vpop.f32.mrb[9].mxu0 }
 0x1fc   :  { %v487_v51 = vpop.f32.mrb[10].mxu0 }
 0x1fd   :  { %515 = vst [vmem:[#allocation7 + $0x28] sm:$0xff] %v487_v51  ;;  %v661_v52 = vpop.f32.mrb[11].mxu0 }
 0x1fe   :  { %v500_v53 = vpop.f32.mrb[4].mxu1 }
 0x1ff   :  { %518 = vst [vmem:[#allocation7 + $0x40] sm:$0xff] %v500_v53  ;;  %v668_v54 = vpop.f32.mrb[5].mxu1 }
 0x200   :  { %v503_v31 = vpop.f32.mrb[6].mxu1 }
 0x201   :  { %786 = shalt.err (!%p783_p6)
}
 0x202   :  { %s787_s12 = scalar_lea.hbm %s1096_s2, 1152 }
 0x203   :  { %p788_p7 = scmp.ne.s32.totalorder %s1096_s2, %s787_s12  ;;  %p791_p8 = scmp.lt.u32.totalorder %s787_s12, %s1096_s2 }
 0x205   :  { %p793_p9 = pnand %p791_p8, %p788_p7 }
 0x207   :  { %796 = shalt.err (!%p793_p9)
}
 0x208   :  { %561 = dma.vmem_to_hbm [thread:$0]  %s556_s8, 1152, %s1096_s2, [#allocation4], %s804_s19, %s804_s19, %s805_s20   ;;  %v669_v55 = vpop.f32.mrb[7].mxu1 }
 0x209   :  { %801 = dma.done.wait [#allocation4], 1152  }
 0x20a   :  { %802 = vsyncadd [#allocation4], 4294966144 }
 0x20b   :  { %565 = vsyncpa [#allocation3], 1 }
 0x20c   :  { %566 = vsyncpa [#allocation6], 1 }
 0x20d   :  { %567 = vsyncpa [#allocation4], 1 }

</bundles_post_ra>
